<compile_context>
chip_gen: v7x
topology: tpu7x:2x2x1
jax: 0.10.0
libtpu: 0.0.40
codegen_flags: <defaults>
</compile_context>

<pallas_src>
import functools

import jax
import jax.numpy as jnp
from jax.experimental import pallas as pl
from jax.experimental.pallas import tpu as pltpu


def _round_up(x: int, m: int) -> int:
    return ((x + m - 1) // m) * m


# ---------------------------------------------------------------------------
# Kernel
# ---------------------------------------------------------------------------
def _mlp4_chain(x, w1, w2, w3, w4, b_ref):
    """4x (matmul + bias + ReLU). x: (rows, Lp) compute dtype -> (rows, Up) f32."""
    cd = w1.dtype
    h = jnp.dot(x, w1, preferred_element_type=jnp.float32)
    h = jnp.maximum(h + b_ref[0:1, :], 0.0)
    h = jnp.dot(h.astype(cd), w2, preferred_element_type=jnp.float32)
    h = jnp.maximum(h + b_ref[1:2, :], 0.0)
    h = jnp.dot(h.astype(cd), w3, preferred_element_type=jnp.float32)
    h = jnp.maximum(h + b_ref[2:3, :], 0.0)
    h = jnp.dot(h.astype(cd), w4, preferred_element_type=jnp.float32)
    h = jnp.maximum(h + b_ref[3:4, :], 0.0)
    return h


def _root_block_kernel(x_ref, w1_ref, w2_ref, w3_ref, w4_ref, b_ref, o_ref):
    """Fused 4-layer MLP with ReLU. All refs are VMEM tiles."""
    # TODO(synk): only the default 'ReLU' activation is implemented; other
    # ACTIVATIONS from the PyTorch module would need their own epilogue.
    w1 = w1_ref[...]
    w2 = w2_ref[...]
    w3 = w3_ref[...]
    w4 = w4_ref[...]
    tb = x_ref.shape[0]
    if tb >= 32 and tb % 32 == 0:
        # Two independent half-tiles: the serially-dependent 4-matmul chains of
        # each half interleave, keeping the MXU busy during the other half's
        # bias+ReLU+cast epilogue.
        half = tb // 2
        ha = _mlp4_chain(x_ref[:half, :], w1, w2, w3, w4, b_ref)
        hb = _mlp4_chain(x_ref[half:, :], w1, w2, w3, w4, b_ref)
        o_ref[:half, :] = ha.astype(o_ref.dtype)
        o_ref[half:, :] = hb.astype(o_ref.dtype)
    else:
        h = _mlp4_chain(x_ref[...], w1, w2, w3, w4, b_ref)
        o_ref[...] = h.astype(o_ref.dtype)


# ---------------------------------------------------------------------------
# One-time parameter preparation (hoisted out of the per-call path)
# ---------------------------------------------------------------------------
def prepare_root_block_params(params, compute_dtype=jnp.bfloat16):
    """Pad weights to lane-dense (multiples of 128) shapes and cast once.

    Args:
      params: dict with w1..w4 of shape (in, out) and b1..b4 of shape (out,).
      compute_dtype: matmul operand dtype (bf16 = native MXU path).

    Returns:
      dict with padded/cast 'w1'..'w4' and a packed f32 bias slab 'b' (8, Up).
    """
    L, U = params["w1"].shape
    Lp, Up = _round_up(L, 128), _round_up(U, 128)

    def pad_w(w, rows, cols):
        w = w.astype(compute_dtype)
        if w.shape != (rows, cols):
            w = jnp.pad(w, ((0, rows - w.shape[0]), (0, cols - w.shape[1])))
        return w

    b = jnp.zeros((8, Up), jnp.float32)
    b = b.at[0, :U].set(params["b1"].astype(jnp.float32))
    b = b.at[1, :U].set(params["b2"].astype(jnp.float32))
    b = b.at[2, :U].set(params["b3"].astype(jnp.float32))
    b = b.at[3, :U].set(params["b4"].astype(jnp.float32))

    return {
        "w1": pad_w(params["w1"], Lp, Up),
        "w2": pad_w(params["w2"], Up, Up),
        "w3": pad_w(params["w3"], Up, Up),
        "w4": pad_w(params["w4"], Up, Up),
        "b": b,
    }


# ---------------------------------------------------------------------------
# Forward
# ---------------------------------------------------------------------------
@functools.partial(
    jax.jit, static_argnames=("units", "batch_tile", "single_buffer_consts"))
def _root_block_forward_impl(x, prepared, *, units, batch_tile,
                             single_buffer_consts):
    B, L = x.shape
    Lp, Up = prepared["w1"].shape
    U = units
    out_dtype = x.dtype
    compute_dtype = prepared["w1"].dtype
    cd_bytes = jnp.dtype(compute_dtype).itemsize
    out_bytes = jnp.dtype(out_dtype).itemsize

    # --- batch tile: sublane multiple; force >=2 grid steps when batch allows
    #     so v7x's two TensorCores both get a share of the "parallel" axis. ---
    TB = max(8, _round_up(min(batch_tile, _round_up(B, 8)), 8))
    Bp = _round_up(B, TB)
    while Bp // TB < 2 and TB > 8:
        TB = max(8, _round_up(TB // 2, 8))
        Bp = _round_up(B, TB)

    # --- VMEM budget: single-buffered resident weights + double-buffered x/out
    #     tiles + f32 intermediates inside the body. Shrink TB until it fits. --
    weight_bytes = (Lp * Up + 3 * Up * Up) * cd_bytes + 8 * Up * 4
    if not single_buffer_consts:
        weight_bytes *= 2

    def est_vmem(tb):
        io = 2 * tb * (Lp * cd_bytes + Up * out_bytes)
        inter = 4 * tb * Up * 4  # f32 accumulators / casts inside the body
        return weight_bytes + io + inter

    try:
        vmem_cap = int(pltpu.get_tpu_info().vmem_capacity_bytes)
    except Exception:  # pragma: no cover - conservative v7x per-core default
        vmem_cap = 64 << 20
    budget = vmem_cap - (16 << 20)  # headroom for Mosaic internal scratch
    while est_vmem(TB) > budget and TB > 8:
        TB = max(8, _round_up(TB // 2, 8))
    Bp = _round_up(B, TB)
    # TODO(synk): if weight_bytes alone exceeds the budget (very large units),
    # split into two pallas_calls (fc1+fc2 / fc3+fc4) instead of spilling.
    vmem_limit = int(min(max(est_vmem(TB) + (8 << 20), 32 << 20),
                         vmem_cap - (4 << 20)))

    # --- pad/cast input only when needed (weights are pre-padded) ------------
    xp = x.astype(compute_dtype)
    if (Bp != B) or (Lp != L):
        xp = jnp.pad(xp, ((0, Bp - B), (0, Lp - L)))

    grid = (Bp // TB,)

    if single_buffer_consts:
        def const_spec(shape):
            # Constant index_map -> DMA'd once, VMEM-resident; Buffered(1)
            # avoids allocating a useless second buffer for each constant.
            return pl.BlockSpec(shape, lambda i: (0, 0),
                                pipeline_mode=pl.Buffered(1))
    else:
        def const_spec(shape):
            return pl.BlockSpec(shape, lambda i: (0, 0))

    flops = 2 * Bp * (Lp * Up + 3 * Up * Up)
    bytes_accessed = (Bp * Lp * cd_bytes + weight_bytes + Bp * Up * out_bytes)
    cost = pl.CostEstimate(flops=flops, transcendentals=0,
                           bytes_accessed=bytes_accessed)

    out = pl.pallas_call(
        _root_block_kernel,
        out_shape=jax.ShapeDtypeStruct((Bp, Up), out_dtype),
        grid_spec=pltpu.PrefetchScalarGridSpec(
            num_scalar_prefetch=0,
            grid=grid,
            in_specs=[
                pl.BlockSpec((TB, Lp), lambda i: (i, 0)),  # x batch tile
                const_spec((Lp, Up)),                      # fc1 weight
                const_spec((Up, Up)),                      # fc2 weight
                const_spec((Up, Up)),                      # fc3 weight
                const_spec((Up, Up)),                      # fc4 weight
                const_spec((8, Up)),                       # packed biases (f32)
            ],
            out_specs=pl.BlockSpec((TB, Up), lambda i: (i, 0)),
        ),
        compiler_params=pltpu.CompilerParams(
            dimension_semantics=("parallel",),
            vmem_limit_bytes=vmem_limit,
        ),
        cost_estimate=cost,
    )(xp, prepared["w1"], prepared["w2"], prepared["w3"], prepared["w4"],
      prepared["b"])

    return out[:B, :U]


def root_block_forward(x, prepared, *, units, batch_tile=512):
    """RootBlock forward: x (batch, backcast_length) -> (batch, units)."""
    try:
        return _root_block_forward_impl(
            x, prepared, units=units, batch_tile=batch_tile,
            single_buffer_consts=True)
    except Exception:
        # Some JAX builds may reject pipeline_mode=pl.Buffered(1); fall back to
        # default double-buffering for the constant operands.
        return _root_block_forward_impl(
            x, prepared, units=units, batch_tile=batch_tile,
            single_buffer_consts=False)


def _ref_forward(x, params):
    """Pure-JAX f32 reference (mirrors PyTorch RootBlock.forward with ReLU)."""
    h = jnp.maximum(x @ params["w1"] + params["b1"], 0.0)
    h = jnp.maximum(h @ params["w2"] + params["b2"], 0.0)
    h = jnp.maximum(h @ params["w3"] + params["b3"], 0.0)
    h = jnp.maximum(h @ params["w4"] + params["b4"], 0.0)
    return h


if __name__ == "__main__":
    # Small deterministic example: batch=8, backcast_length=16, units=32.
    batch, backcast_length, units = 8, 16, 32
    key = jax.random.PRNGKey(0)
    ks = jax.random.split(key, 9)
    scale = 0.1

    x = jax.random.normal(ks[0], (batch, backcast_length), jnp.float32)
    params = {
        "w1": scale * jax.random.normal(ks[1], (backcast_length, units), jnp.float32),
        "b1": scale * jax.random.normal(ks[2], (units,), jnp.float32),
        "w2": scale * jax.random.normal(ks[3], (units, units), jnp.float32),
        "b2": scale * jax.random.normal(ks[4], (units,), jnp.float32),
        "w3": scale * jax.random.normal(ks[5], (units, units), jnp.float32),
        "b3": scale * jax.random.normal(ks[6], (units,), jnp.float32),
        "w4": scale * jax.random.normal(ks[7], (units, units), jnp.float32),
        "b4": scale * jax.random.normal(ks[8], (units,), jnp.float32),
    }

    # One-time prep: pad to lane-dense shapes, cast weights to bf16.
    prepared = prepare_root_block_params(params, compute_dtype=jnp.bfloat16)

    out = root_block_forward(x, prepared, units=units)
    out = jax.block_until_ready(out)

    ref = _ref_forward(x, params)
    assert out.shape == (batch, units), out.shape
    # bf16 matmul operands (f32 accumulation) -> slightly loosened tolerance.
    assert jnp.allclose(out, ref, atol=2e-2, rtol=2e-2), (
        float(jnp.max(jnp.abs(out - ref))))

    print("KERNEL_OK")
</pallas_src>

<mosaic_0001>
module attributes {stable_mosaic.version = 11 : i64} {
  func.func @_root_block_kernel(%arg0: i32, %arg1: memref<8x128xbf16, #tpu.memory_space<vmem>>, %arg2: memref<128x128xbf16, #tpu.memory_space<vmem>>, %arg3: memref<128x128xbf16, #tpu.memory_space<vmem>>, %arg4: memref<128x128xbf16, #tpu.memory_space<vmem>>, %arg5: memref<128x128xbf16, #tpu.memory_space<vmem>>, %arg6: memref<8x128xf32, #tpu.memory_space<vmem>>, %arg7: memref<8x128xf32, #tpu.memory_space<vmem>>) attributes {dimension_semantics = [#tpu.dimension_semantics<parallel>], iteration_bounds = array<i64: 1>, scalar_prefetch = 0 : i64, scratch_operands = 0 : i64, tpu.core_type = #tpu.core_type<tc>, window_params = [{transform_indices = @transform_0, window_bounds = array<i64: 8, 128>}, {pipeline_mode = #tpu.pipeline_mode<synchronous>, transform_indices = @transform_1, window_bounds = array<i64: 128, 128>}, {pipeline_mode = #tpu.pipeline_mode<synchronous>, transform_indices = @transform_2, window_bounds = array<i64: 128, 128>}, {pipeline_mode = #tpu.pipeline_mode<synchronous>, transform_indices = @transform_3, window_bounds = array<i64: 128, 128>}, {pipeline_mode = #tpu.pipeline_mode<synchronous>, transform_indices = @transform_4, window_bounds = array<i64: 128, 128>}, {pipeline_mode = #tpu.pipeline_mode<synchronous>, transform_indices = @transform_5, window_bounds = array<i64: 8, 128>}, {transform_indices = @transform_6, window_bounds = array<i64: 8, 128>}]} {
    %c0 = arith.constant 0 : index
    %c0_0 = arith.constant 0 : index
    %0 = vector.load %arg2[%c0, %c0_0] : memref<128x128xbf16, #tpu.memory_space<vmem>>, vector<128x128xbf16>
    %c0_1 = arith.constant 0 : index
    %c0_2 = arith.constant 0 : index
    %1 = vector.load %arg3[%c0_1, %c0_2] : memref<128x128xbf16, #tpu.memory_space<vmem>>, vector<128x128xbf16>
    %c0_3 = arith.constant 0 : index
    %c0_4 = arith.constant 0 : index
    %2 = vector.load %arg4[%c0_3, %c0_4] : memref<128x128xbf16, #tpu.memory_space<vmem>>, vector<128x128xbf16>
    %c0_5 = arith.constant 0 : index
    %c0_6 = arith.constant 0 : index
    %3 = vector.load %arg5[%c0_5, %c0_6] : memref<128x128xbf16, #tpu.memory_space<vmem>>, vector<128x128xbf16>
    %c0_7 = arith.constant 0 : index
    %c0_8 = arith.constant 0 : index
    %4 = vector.load %arg1[%c0_7, %c0_8] : memref<8x128xbf16, #tpu.memory_space<vmem>>, vector<8x128xbf16>
    %cst = arith.constant dense<0.000000e+00> : vector<8x128xf32>
    %5 = tpu.matmul %4, %0, %cst {dimension_numbers = #tpu.dot_dimension_numbers<[1], [0], [0], [1], [0, 0, 1, 1], [], []>} : vector<8x128xbf16>, vector<128x128xbf16>, vector<8x128xf32> -> vector<8x128xf32>
    %c0_9 = arith.constant 0 : index
    %c0_10 = arith.constant 0 : index
    %6 = vector.load %arg6[%c0_9, %c0_10] : memref<8x128xf32, #tpu.memory_space<vmem>>, vector<1x128xf32>
    %7 = vector.broadcast %6 : vector<1x128xf32> to vector<8x128xf32>
    %8 = arith.addf %5, %7 : vector<8x128xf32>
    %cst_11 = arith.constant 0.000000e+00 : f32
    %9 = vector.broadcast %cst_11 : f32 to vector<8x128xf32>
    %10 = arith.maximumf %8, %9 : vector<8x128xf32>
    %11 = arith.truncf %10 : vector<8x128xf32> to vector<8x128xbf16>
    %cst_12 = arith.constant dense<0.000000e+00> : vector<8x128xf32>
    %12 = tpu.matmul %11, %1, %cst_12 {dimension_numbers = #tpu.dot_dimension_numbers<[1], [0], [0], [1], [0, 0, 1, 1], [], []>} : vector<8x128xbf16>, vector<128x128xbf16>, vector<8x128xf32> -> vector<8x128xf32>
    %c1 = arith.constant 1 : index
    %c0_13 = arith.constant 0 : index
    %13 = vector.load %arg6[%c1, %c0_13] : memref<8x128xf32, #tpu.memory_space<vmem>>, vector<1x128xf32>
    %14 = vector.broadcast %13 : vector<1x128xf32> to vector<8x128xf32>
    %15 = arith.addf %12, %14 : vector<8x128xf32>
    %cst_14 = arith.constant 0.000000e+00 : f32
    %16 = vector.broadcast %cst_14 : f32 to vector<8x128xf32>
    %17 = arith.maximumf %15, %16 : vector<8x128xf32>
    %18 = arith.truncf %17 : vector<8x128xf32> to vector<8x128xbf16>
    %cst_15 = arith.constant dense<0.000000e+00> : vector<8x128xf32>
    %19 = tpu.matmul %18, %2, %cst_15 {dimension_numbers = #tpu.dot_dimension_numbers<[1], [0], [0], [1], [0, 0, 1, 1], [], []>} : vector<8x128xbf16>, vector<128x128xbf16>, vector<8x128xf32> -> vector<8x128xf32>
    %c2 = arith.constant 2 : index
    %c0_16 = arith.constant 0 : index
    %20 = vector.load %arg6[%c2, %c0_16] : memref<8x128xf32, #tpu.memory_space<vmem>>, vector<1x128xf32>
    %21 = vector.broadcast %20 : vector<1x128xf32> to vector<8x128xf32>
    %22 = arith.addf %19, %21 : vector<8x128xf32>
    %cst_17 = arith.constant 0.000000e+00 : f32
    %23 = vector.broadcast %cst_17 : f32 to vector<8x128xf32>
    %24 = arith.maximumf %22, %23 : vector<8x128xf32>
    %25 = arith.truncf %24 : vector<8x128xf32> to vector<8x128xbf16>
    %cst_18 = arith.constant dense<0.000000e+00> : vector<8x128xf32>
    %26 = tpu.matmul %25, %3, %cst_18 {dimension_numbers = #tpu.dot_dimension_numbers<[1], [0], [0], [1], [0, 0, 1, 1], [], []>} : vector<8x128xbf16>, vector<128x128xbf16>, vector<8x128xf32> -> vector<8x128xf32>
    %c3 = arith.constant 3 : index
    %c0_19 = arith.constant 0 : index
    %27 = vector.load %arg6[%c3, %c0_19] : memref<8x128xf32, #tpu.memory_space<vmem>>, vector<1x128xf32>
    %28 = vector.broadcast %27 : vector<1x128xf32> to vector<8x128xf32>
    %29 = arith.addf %26, %28 : vector<8x128xf32>
    %cst_20 = arith.constant 0.000000e+00 : f32
    %30 = vector.broadcast %cst_20 : f32 to vector<8x128xf32>
    %31 = arith.maximumf %29, %30 : vector<8x128xf32>
    %c0_21 = arith.constant 0 : index
    %c0_22 = arith.constant 0 : index
    %32 = vector.load %arg7[%c0_21, %c0_22] : memref<8x128xf32, #tpu.memory_space<vmem>>, vector<8x128xf32>
    tpu.vector_store %arg7[%c0_21, %c0_22], %31 {strides = array<i32>} : memref<8x128xf32, #tpu.memory_space<vmem>>, vector<8x128xf32>,
    return
  }
  func.func @transform_0(%arg0: i32) -> (i32, i32) {
    %c0_i32 = arith.constant 0 : i32
    %c0_i32_0 = arith.constant 0 : i32
    return %arg0, %c0_i32 : i32, i32
  }
  func.func @transform_1(%arg0: i32) -> (i32, i32) {
    %c0_i32 = arith.constant 0 : i32
    %c0_i32_0 = arith.constant 0 : i32
    %c0_i32_1 = arith.constant 0 : i32
    return %c0_i32, %c0_i32_0 : i32, i32
  }
  func.func @transform_2(%arg0: i32) -> (i32, i32) {
    %c0_i32 = arith.constant 0 : i32
    %c0_i32_0 = arith.constant 0 : i32
    %c0_i32_1 = arith.constant 0 : i32
    return %c0_i32, %c0_i32_0 : i32, i32
  }
  func.func @transform_3(%arg0: i32) -> (i32, i32) {
    %c0_i32 = arith.constant 0 : i32
    %c0_i32_0 = arith.constant 0 : i32
    %c0_i32_1 = arith.constant 0 : i32
    return %c0_i32, %c0_i32_0 : i32, i32
  }
  func.func @transform_4(%arg0: i32) -> (i32, i32) {
    %c0_i32 = arith.constant 0 : i32
    %c0_i32_0 = arith.constant 0 : i32
    %c0_i32_1 = arith.constant 0 : i32
    return %c0_i32, %c0_i32_0 : i32, i32
  }
  func.func @transform_5(%arg0: i32) -> (i32, i32) {
    %c0_i32 = arith.constant 0 : i32
    %c0_i32_0 = arith.constant 0 : i32
    %c0_i32_1 = arith.constant 0 : i32
    return %c0_i32, %c0_i32_0 : i32, i32
  }
  func.func @transform_6(%arg0: i32) -> (i32, i32) {
    %c0_i32 = arith.constant 0 : i32
    %c0_i32_0 = arith.constant 0 : i32
    return %arg0, %c0_i32 : i32, i32
  }
}

module attributes {stable_mosaic.version = 11 : i64} {
  func.func @_root_block_kernel(%arg0: i32, %arg1: memref<8x128xbf16, #tpu.memory_space<vmem>>, %arg2: memref<128x128xbf16, #tpu.memory_space<vmem>>, %arg3: memref<128x128xbf16, #tpu.memory_space<vmem>>, %arg4: memref<128x128xbf16, #tpu.memory_space<vmem>>, %arg5: memref<128x128xbf16, #tpu.memory_space<vmem>>, %arg6: memref<8x128xf32, #tpu.memory_space<vmem>>, %arg7: memref<8x128xf32, #tpu.memory_space<vmem>>) attributes {dimension_semantics = [#tpu.dimension_semantics<parallel>], iteration_bounds = array<i64: 1>, scalar_prefetch = 0 : i64, scratch_operands = 0 : i64, tpu.core_type = #tpu.core_type<tc>, window_params = [{transform_indices = @transform_0, window_bounds = array<i64: 8, 128>}, {pipeline_mode = #tpu.pipeline_mode<synchronous>, transform_indices = @transform_1, window_bounds = array<i64: 128, 128>}, {pipeline_mode = #tpu.pipeline_mode<synchronous>, transform_indices = @transform_2, window_bounds = array<i64: 128, 128>}, {pipeline_mode = #tpu.pipeline_mode<synchronous>, transform_indices = @transform_3, window_bounds = array<i64: 128, 128>}, {pipeline_mode = #tpu.pipeline_mode<synchronous>, transform_indices = @transform_4, window_bounds = array<i64: 128, 128>}, {pipeline_mode = #tpu.pipeline_mode<synchronous>, transform_indices = @transform_5, window_bounds = array<i64: 8, 128>}, {transform_indices = @transform_6, window_bounds = array<i64: 8, 128>}]} {
    %c0 = arith.constant 0 : index
    %c0_0 = arith.constant 0 : index
    %0 = vector.load %arg2[%c0, %c0_0] : memref<128x128xbf16, #tpu.memory_space<vmem>>, vector<128x128xbf16>
    %c0_1 = arith.constant 0 : index
    %c0_2 = arith.constant 0 : index
    %1 = vector.load %arg3[%c0_1, %c0_2] : memref<128x128xbf16, #tpu.memory_space<vmem>>, vector<128x128xbf16>
    %c0_3 = arith.constant 0 : index
    %c0_4 = arith.constant 0 : index
    %2 = vector.load %arg4[%c0_3, %c0_4] : memref<128x128xbf16, #tpu.memory_space<vmem>>, vector<128x128xbf16>
    %c0_5 = arith.constant 0 : index
    %c0_6 = arith.constant 0 : index
    %3 = vector.load %arg5[%c0_5, %c0_6] : memref<128x128xbf16, #tpu.memory_space<vmem>>, vector<128x128xbf16>
    %c0_7 = arith.constant 0 : index
    %c0_8 = arith.constant 0 : index
    %4 = vector.load %arg1[%c0_7, %c0_8] : memref<8x128xbf16, #tpu.memory_space<vmem>>, vector<8x128xbf16>
    %cst = arith.constant dense<0.000000e+00> : vector<8x128xf32>
    %5 = tpu.matmul %4, %0, %cst {dimension_numbers = #tpu.dot_dimension_numbers<[1], [0], [0], [1], [0, 0, 1, 1], [], []>} : vector<8x128xbf16>, vector<128x128xbf16>, vector<8x128xf32> -> vector<8x128xf32>
    %c0_9 = arith.constant 0 : index
    %c0_10 = arith.constant 0 : index
    %6 = vector.load %arg6[%c0_9, %c0_10] : memref<8x128xf32, #tpu.memory_space<vmem>>, vector<1x128xf32>
    %7 = vector.broadcast %6 : vector<1x128xf32> to vector<8x128xf32>
    %8 = arith.addf %5, %7 : vector<8x128xf32>
    %cst_11 = arith.constant 0.000000e+00 : f32
    %9 = vector.broadcast %cst_11 : f32 to vector<8x128xf32>
    %10 = arith.maximumf %8, %9 : vector<8x128xf32>
    %11 = arith.truncf %10 : vector<8x128xf32> to vector<8x128xbf16>
    %cst_12 = arith.constant dense<0.000000e+00> : vector<8x128xf32>
    %12 = tpu.matmul %11, %1, %cst_12 {dimension_numbers = #tpu.dot_dimension_numbers<[1], [0], [0], [1], [0, 0, 1, 1], [], []>} : vector<8x128xbf16>, vector<128x128xbf16>, vector<8x128xf32> -> vector<8x128xf32>
    %c1 = arith.constant 1 : index
    %c0_13 = arith.constant 0 : index
    %13 = vector.load %arg6[%c1, %c0_13] : memref<8x128xf32, #tpu.memory_space<vmem>>, vector<1x128xf32>
    %14 = vector.broadcast %13 : vector<1x128xf32> to vector<8x128xf32>
    %15 = arith.addf %12, %14 : vector<8x128xf32>
    %cst_14 = arith.constant 0.000000e+00 : f32
    %16 = vector.broadcast %cst_14 : f32 to vector<8x128xf32>
    %17 = arith.maximumf %15, %16 : vector<8x128xf32>
    %18 = arith.truncf %17 : vector<8x128xf32> to vector<8x128xbf16>
    %cst_15 = arith.constant dense<0.000000e+00> : vector<8x128xf32>
    %19 = tpu.matmul %18, %2, %cst_15 {dimension_numbers = #tpu.dot_dimension_numbers<[1], [0], [0], [1], [0, 0, 1, 1], [], []>} : vector<8x128xbf16>, vector<128x128xbf16>, vector<8x128xf32> -> vector<8x128xf32>
    %c2 = arith.constant 2 : index
    %c0_16 = arith.constant 0 : index
    %20 = vector.load %arg6[%c2, %c0_16] : memref<8x128xf32, #tpu.memory_space<vmem>>, vector<1x128xf32>
    %21 = vector.broadcast %20 : vector<1x128xf32> to vector<8x128xf32>
    %22 = arith.addf %19, %21 : vector<8x128xf32>
    %cst_17 = arith.constant 0.000000e+00 : f32
    %23 = vector.broadcast %cst_17 : f32 to vector<8x128xf32>
    %24 = arith.maximumf %22, %23 : vector<8x128xf32>
    %25 = arith.truncf %24 : vector<8x128xf32> to vector<8x128xbf16>
    %cst_18 = arith.constant dense<0.000000e+00> : vector<8x128xf32>
    %26 = tpu.matmul %25, %3, %cst_18 {dimension_numbers = #tpu.dot_dimension_numbers<[1], [0], [0], [1], [0, 0, 1, 1], [], []>} : vector<8x128xbf16>, vector<128x128xbf16>, vector<8x128xf32> -> vector<8x128xf32>
    %c3 = arith.constant 3 : index
    %c0_19 = arith.constant 0 : index
    %27 = vector.load %arg6[%c3, %c0_19] : memref<8x128xf32, #tpu.memory_space<vmem>>, vector<1x128xf32>
    %28 = vector.broadcast %27 : vector<1x128xf32> to vector<8x128xf32>
    %29 = arith.addf %26, %28 : vector<8x128xf32>
    %cst_20 = arith.constant 0.000000e+00 : f32
    %30 = vector.broadcast %cst_20 : f32 to vector<8x128xf32>
    %31 = arith.maximumf %29, %30 : vector<8x128xf32>
    %c0_21 = arith.constant 0 : index
    %c0_22 = arith.constant 0 : index
    %32 = vector.load %arg7[%c0_21, %c0_22] : memref<8x128xf32, #tpu.memory_space<vmem>>, vector<8x128xf32>
    tpu.vector_store %arg7[%c0_21, %c0_22], %31 {strides = array<i32>} : memref<8x128xf32, #tpu.memory_space<vmem>>, vector<8x128xf32>,
    return
  }
  func.func @transform_0(%arg0: i32) -> (i32, i32) {
    %c0_i32 = arith.constant 0 : i32
    %c0_i32_0 = arith.constant 0 : i32
    return %arg0, %c0_i32 : i32, i32
  }
  func.func @transform_1(%arg0: i32) -> (i32, i32) {
    %c0_i32 = arith.constant 0 : i32
    %c0_i32_0 = arith.constant 0 : i32
    %c0_i32_1 = arith.constant 0 : i32
    return %c0_i32, %c0_i32_0 : i32, i32
  }
  func.func @transform_2(%arg0: i32) -> (i32, i32) {
    %c0_i32 = arith.constant 0 : i32
    %c0_i32_0 = arith.constant 0 : i32
    %c0_i32_1 = arith.constant 0 : i32
    return %c0_i32, %c0_i32_0 : i32, i32
  }
  func.func @transform_3(%arg0: i32) -> (i32, i32) {
    %c0_i32 = arith.constant 0 : i32
    %c0_i32_0 = arith.constant 0 : i32
    %c0_i32_1 = arith.constant 0 : i32
    return %c0_i32, %c0_i32_0 : i32, i32
  }
  func.func @transform_4(%arg0: i32) -> (i32, i32) {
    %c0_i32 = arith.constant 0 : i32
    %c0_i32_0 = arith.constant 0 : i32
    %c0_i32_1 = arith.constant 0 : i32
    return %c0_i32, %c0_i32_0 : i32, i32
  }
  func.func @transform_5(%arg0: i32) -> (i32, i32) {
    %c0_i32 = arith.constant 0 : i32
    %c0_i32_0 = arith.constant 0 : i32
    %c0_i32_1 = arith.constant 0 : i32
    return %c0_i32, %c0_i32_0 : i32, i32
  }
  func.func @transform_6(%arg0: i32) -> (i32, i32) {
    %c0_i32 = arith.constant 0 : i32
    %c0_i32_0 = arith.constant 0 : i32
    return %arg0, %c0_i32 : i32, i32
  }
}

</mosaic_0001>

<bundles_post_ra>
// kernel: _root_block_forward_impl.1
= control target key start
LH: loop header
LB: loop body
LE: loop exit
PB: predicated region body
PF: predicated region fallthrough
CT: control target
= control target key end

     0   :  { %11 = vsyncpa [#allocation3], 0  ;;  %s1038_s0 = inlined_call_operand.vmem [shape: bf16[8,128], index: 0, kind: input, shape index: {}]   ;;  %s1039_s1 = inlined_call_operand.hbm [shape: bf16[128,128], index: 1, kind: input, shape index: {}]   ;;  %s1040_s2 = inlined_call_operand.hbm [shape: bf16[128,128], index: 2, kind: input, shape index: {}]   ;;  %s1041_s3 = inlined_call_operand.hbm [shape: bf16[128,128], index: 3, kind: input, shape index: {}]   ;;  %s1042_s4 = inlined_call_operand.hbm [shape: bf16[128,128], index: 4, kind: input, shape index: {}]   ;;  %s1043_s5 = inlined_call_operand.vmem [shape: f32[8,128], index: 5, kind: input, shape index: {}]   ;;  %s1044_s6 = inlined_call_operand.hbm [shape: f32[8,128], index: 6, kind: output, shape index: {}]  }
   0x1   :  { %12 = vsyncpa [#allocation6], 0 }
   0x2   :  { %13 = vsyncpa [#allocation9], 0 }
   0x3   :  { %14 = vsyncpa [#allocation4], 0  ;;  %s853_s21 = smov [#allocation5]   ;;  %s854_s23 = smov [#allocation2]  }
   0x4   :  { %s34_s22 = sshll.u32 %s853_s21, 4  ;;  %s22_s24 = sshll.u32 %s854_s23, 4  ;;  %s35_s22 = int_to_ptr.vmem [resolvable:$true] %s34_s22  ;;  %s897_s24 = int_to_ptr.vmem [resolvable:$true] %s22_s24 }
   0x5   :  { %s735_s27 = scalar_lea.hbm %s1040_s2, 1024 }
   0x6   :  { %p736_p0 = scmp.ne.s32.totalorder %s1040_s2, %s735_s27  ;;  %p739_p1 = scmp.lt.u32.totalorder %s735_s27, %s1040_s2 }
   0x8   :  { %p741_p2 = pnand %p739_p1, %p736_p0 }
   0xa   :  { %744 = shalt.err (!%p741_p2)
}
   0xb   :  { %s745_s8 = scalar_lea.vmem %s35_s22, 1024  ;;  %p750_p4 = scmp.lt.s32.totalorder %s35_s22, %s35_s22 }
   0xc   :  { %p746_p3 = scmp.ne.s32.totalorder %s35_s22, %s745_s8  ;;  %p751_p5 = scmp.lt.s32.totalorder %s745_s8, %s745_s8 }
   0xe   :  { %p752_p6 = por %p751_p5, %p750_p4 }
  0x10   :  { %p753_p7 = pnand %p752_p6, %p746_p3 }
  0x12   :  { %756 = shalt.err (!%p753_p7)
}
  0x13   :  { %s855_s9 = smov 64   ;;  %s856_s10 = smov 4  }
  0x14   :  { %40 = dma.hbm_to_vmem [thread:$0]  %s1040_s2, 1024, %s35_s22, [#allocation6], %s855_s9, %s855_s9, %s856_s10  }
  0x15   :  { %s757_s15 = scalar_lea.hbm %s1039_s1, 1024 }
  0x16   :  { %p758_p8 = scmp.ne.s32.totalorder %s1039_s1, %s757_s15  ;;  %p761_p9 = scmp.lt.u32.totalorder %s757_s15, %s1039_s1 }
  0x18   :  { %p763_p10 = pnand %p761_p9, %p758_p8 }
  0x1a   :  { %766 = shalt.err (!%p763_p10)
}
  0x1b   :  { %s767_s20 = scalar_lea.vmem %s897_s24, 1024  ;;  %p772_p12 = scmp.lt.s32.totalorder %s897_s24, %s897_s24 }
  0x1c   :  { %p768_p11 = scmp.ne.s32.totalorder %s897_s24, %s767_s20  ;;  %p773_p13 = scmp.lt.s32.totalorder %s767_s20, %s767_s20 }
  0x1e   :  { %p774_p0 = por %p773_p13, %p772_p12 }
  0x20   :  { %p775_p1 = pnand %p774_p0, %p768_p11 }
  0x22   :  { %778 = shalt.err (!%p775_p1)
}
  0x23   :  { %28 = dma.hbm_to_vmem [thread:$0]  %s1039_s1, 1024, %s897_s24, [#allocation3], %s855_s9, %s855_s9, %s856_s10  }
  0x24   :  { %s857_s22 = smov [#allocation7]   ;;  %s858_s25 = smov [#allocation8]  }
  0x25   :  { %s46_s23 = sshll.u32 %s857_s22, 4  ;;  %s58_s26 = sshll.u32 %s858_s25, 4  ;;  %s47_s23 = int_to_ptr.vmem [resolvable:$true] %s46_s23  ;;  %s934_s26 = int_to_ptr.vmem [resolvable:$true] %s58_s26 }
  0x26   :  { %s779_s29 = scalar_lea.hbm %s1041_s3, 1024 }
  0x27   :  { %p780_p2 = scmp.ne.s32.totalorder %s1041_s3, %s779_s29  ;;  %p783_p3 = scmp.lt.u32.totalorder %s779_s29, %s1041_s3 }
  0x29   :  { %p785_p4 = pnand %p783_p3, %p780_p2 }
  0x2b   :  { %788 = shalt.err (!%p785_p4)
}
  0x2c   :  { %s789_s1 = scalar_lea.vmem %s47_s23, 1024  ;;  %p794_p6 = scmp.lt.s32.totalorder %s47_s23, %s47_s23 }
  0x2d   :  { %p790_p5 = scmp.ne.s32.totalorder %s47_s23, %s789_s1  ;;  %p795_p7 = scmp.lt.s32.totalorder %s789_s1, %s789_s1 }
  0x2f   :  { %p796_p8 = por %p795_p7, %p794_p6 }
  0x31   :  { %p797_p9 = pnand %p796_p8, %p790_p5 }
  0x33   :  { %800 = shalt.err (!%p797_p9)
}
  0x34   :  { %52 = dma.hbm_to_vmem [thread:$0]  %s1041_s3, 1024, %s47_s23, [#allocation6], %s855_s9, %s855_s9, %s856_s10  }
  0x35   :  { %s801_s15 = scalar_lea.hbm %s1042_s4, 1024 }
  0x36   :  { %p802_p10 = scmp.ne.s32.totalorder %s1042_s4, %s801_s15  ;;  %p805_p11 = scmp.lt.u32.totalorder %s801_s15, %s1042_s4 }
  0x38   :  { %p807_p12 = pnand %p805_p11, %p802_p10 }
  0x3a   :  { %810 = shalt.err (!%p807_p12)
}
  0x3b   :  { %s811_s20 = scalar_lea.vmem %s934_s26, 1024  ;;  %p816_p0 = scmp.lt.s32.totalorder %s934_s26, %s934_s26 }
  0x3c   :  { %p812_p13 = scmp.ne.s32.totalorder %s934_s26, %s811_s20  ;;  %p817_p1 = scmp.lt.s32.totalorder %s811_s20, %s811_s20 }
  0x3e   :  { %p818_p2 = por %p817_p1, %p816_p0 }
  0x40   :  { %p819_p3 = pnand %p818_p2, %p812_p13 }
  0x42   :  { %822 = shalt.err (!%p819_p3)
}
  0x43   :  { %64 = dma.hbm_to_vmem [thread:$0]  %s1042_s4, 1024, %s934_s26, [#allocation9], %s855_s9, %s855_s9, %s856_s10  }
  0x44   :  { %845 = dma.done.wait [#allocation3], 1024  }
  0x45   :  { %846 = vsyncadd [#allocation3], 4294966272 }
  0x46   :  { %847 = dma.done.wait [#allocation6], 2048  }
  0x47   :  { %848 = vsyncadd [#allocation6], 4294965248 }
  0x48   :  { %849 = dma.done.wait [#allocation9], 1024  }
  0x49   :  { %850 = vsyncadd [#allocation9], 4294966272  ;;  %v859_v0 = vmov 0.0   ;;  %vm860_vm0 = vmmov 0   ;;  %v703_v1 = vld [vmem:[#allocation2] sm:$0xff]   ;;  %v704_v2 = vld [vmem:[#allocation2 + $0x8] sm:$0xff]  }
  0x4a   :  { %614 = vmatprep.subr.bf16.mxu0 %v859_v0  ;;  %630 = vmatprep.mubr.msk.bf16.mxu0 %vm860_vm0, %v859_v0  ;;  %v705_v3 = vld [vmem:[#allocation2 + $0x10] sm:$0xff]   ;;  %v711_v4 = vld [vmem:[#allocation5] sm:$0xff]   ;;  %v706_v5 = vld [vmem:[#allocation2 + $0x18] sm:$0xff]   ;;  %s861_s28 = smov [#allocation10]  }
  0x4b   :  { %634 = vmatprep.subr.bf16.mxu1 %v859_v0  ;;  %650 = vmatprep.mubr.msk.bf16.mxu1 %vm860_vm0, %v859_v0  ;;  %v712_v6 = vld [vmem:[#allocation5 + $0x8] sm:$0xff]   ;;  %v707_v7 = vld [vmem:[#allocation2 + $0x20] sm:$0xff]   ;;  %v713_v8 = vld [vmem:[#allocation5 + $0x10] sm:$0xff]   ;;  %s531_s29 = sshll.u32 %s861_s28, 4  ;;  %s532_s29 = int_to_ptr.vmem [resolvable:$true] %s531_s29 }
  0x4c   :  { %615 = vmatpush3.bf16.msra.mxu0 %v703_v1  ;;  %635 = vmatpush3.bf16.msra.mxu1 %v711_v4  ;;  %v708_v9 = vld [vmem:[#allocation2 + $0x28] sm:$0xff]   ;;  %v714_v10 = vld [vmem:[#allocation5 + $0x18] sm:$0xff]   ;;  %v709_v11 = vld [vmem:[#allocation2 + $0x30] sm:$0xff]   ;;  %s823_s30 = scalar_lea.vmem %s532_s29, 128  ;;  %p828_p5 = scmp.lt.s32.totalorder %s532_s29, %s532_s29 }
  0x4d   :  { %616 = vmatprep.subr.bf16.mxu0 %v859_v0  ;;  %636 = vmatprep.subr.bf16.mxu1 %v859_v0  ;;  %v715_v12 = vld [vmem:[#allocation5 + $0x20] sm:$0xff]   ;;  %v710_v13 = vld [vmem:[#allocation2 + $0x38] sm:$0xff]   ;;  %v716_v14 = vld [vmem:[#allocation5 + $0x28] sm:$0xff]   ;;  %p824_p4 = scmp.ne.s32.totalorder %s532_s29, %s823_s30  ;;  %p829_p6 = scmp.lt.s32.totalorder %s823_s30, %s823_s30 }
  0x4e   :  { %v144_v15 = vld [vmem:[%s1038_s0] sm:$0xf]  ;;  %v717_v16 = vld [vmem:[#allocation5 + $0x30] sm:$0xff]   ;;  %v719_v18 = vld [vmem:[#allocation7] sm:$0xff]  }
  0x4f   :  { %v718_v17 = vld [vmem:[#allocation5 + $0x38] sm:$0xff]   ;;  %v720_v19 = vld [vmem:[#allocation7 + $0x8] sm:$0xff]   ;;  %v721_v20 = vld [vmem:[#allocation7 + $0x10] sm:$0xff]   ;;  %p830_p7 = por %p829_p6, %p828_p5 }
  0x50   :  { %617 = vmatpush3.bf16.msra.mxu0 %v704_v2  ;;  %637 = vmatpush3.bf16.msra.mxu1 %v712_v6  ;;  %v722_v21 = vld [vmem:[#allocation7 + $0x18] sm:$0xff]   ;;  %v723_v22 = vld [vmem:[#allocation7 + $0x20] sm:$0xff]   ;;  %v724_v23 = vld [vmem:[#allocation7 + $0x28] sm:$0xff]  }
  0x51   :  { %618 = vmatprep.subr.bf16.mxu0 %v859_v0  ;;  %638 = vmatprep.subr.bf16.mxu1 %v859_v0  ;;  %v542_v24 = vld [vmem:[%s1043_s5] ss:$0 sm:$0xff]  ;;  %v725_v32 = vld [vmem:[#allocation7 + $0x30] sm:$0xff]   ;;  %v727_v34 = vld [vmem:[#allocation8] sm:$0xff]   ;;  %p831_p8 = pnand %p830_p7, %p824_p4 }
  0x52   :  { %v726_v33 = vld [vmem:[#allocation7 + $0x38] sm:$0xff]   ;;  %v728_v35 = vld [vmem:[#allocation8 + $0x8] sm:$0xff]   ;;  %v729_v36 = vld [vmem:[#allocation8 + $0x10] sm:$0xff]  }
  0x53   :  { %v730_v37 = vld [vmem:[#allocation8 + $0x18] sm:$0xff]   ;;  %v731_v38 = vld [vmem:[#allocation8 + $0x20] sm:$0xff]   ;;  %v732_v39 = vld [vmem:[#allocation8 + $0x28] sm:$0xff]  }
  0x54   :  { %619 = vmatpush3.bf16.msra.mxu0 %v705_v3  ;;  %639 = vmatpush3.bf16.msra.mxu1 %v713_v8  ;;  %v551_v40 = vld [vmem:[%s1043_s5 + $0x1] ss:$0 sm:$0xff]  ;;  %v733_v48 = vld [vmem:[#allocation8 + $0x30] sm:$0xff]   ;;  %v560_v50 = vld [vmem:[%s1043_s5 + $0x2] ss:$0 sm:$0xff] }
  0x55   :  { %620 = vmatprep.subr.bf16.mxu0 %v859_v0  ;;  %640 = vmatprep.subr.bf16.mxu1 %v859_v0  ;;  %v734_v49 = vld [vmem:[#allocation8 + $0x38] sm:$0xff]  }
  0x56   :  { %v569_v58 = vld [vmem:[%s1043_s5 + $0x3] ss:$0 sm:$0xff] }
  0x58   :  { %621 = vmatpush3.bf16.msra.mxu0 %v706_v5  ;;  %641 = vmatpush3.bf16.msra.mxu1 %v714_v10 }
  0x59   :  { %622 = vmatprep.subr.bf16.mxu0 %v859_v0  ;;  %642 = vmatprep.subr.bf16.mxu1 %v859_v0 }
  0x5c   :  { %623 = vmatpush3.bf16.msra.mxu0 %v707_v7  ;;  %643 = vmatpush3.bf16.msra.mxu1 %v715_v12 }
  0x5d   :  { %624 = vmatprep.subr.bf16.mxu0 %v859_v0  ;;  %644 = vmatprep.subr.bf16.mxu1 %v859_v0 }
  0x60   :  { %625 = vmatpush3.bf16.msra.mxu0 %v708_v9  ;;  %645 = vmatpush3.bf16.msra.mxu1 %v716_v14 }
  0x61   :  { %626 = vmatprep.subr.bf16.mxu0 %v859_v0  ;;  %646 = vmatprep.subr.bf16.mxu1 %v859_v0 }
  0x64   :  { %627 = vmatpush3.bf16.msra.mxu0 %v709_v11  ;;  %647 = vmatpush3.bf16.msra.mxu1 %v717_v16 }
  0x65   :  { %628 = vmatprep.subr.bf16.mxu0 %v859_v0  ;;  %648 = vmatprep.subr.bf16.mxu1 %v859_v0 }
  0x68   :  { %629 = vmatpush3.bf16.msra.mxu0 %v710_v13  ;;  %649 = vmatpush3.bf16.msra.mxu1 %v718_v17 }
  0x69   :  { %654 = vmatprep.subr.bf16.mxu0 %v859_v0  ;;  %674 = vmatprep.subr.bf16.mxu1 %v859_v0 }
  0x6b   :  { %631 = vmatmul.mubr.bf16.vlgmr.msra.gmra.mrb[0].mxu0 %v144_v15 }
  0x6c   :  { %670 = vmatprep.mubr.msk.bf16.mxu0 %vm860_vm0, %v859_v0  ;;  %655 = vmatpush3.bf16.msra.mxu0 %v719_v18 }
  0x6d   :  { %656 = vmatprep.subr.bf16.mxu0 %v859_v0 }
  0x70   :  { %657 = vmatpush3.bf16.msra.mxu0 %v720_v19 }
  0x71   :  { %658 = vmatprep.subr.bf16.mxu0 %v859_v0 }
  0x74   :  { %659 = vmatpush3.bf16.msra.mxu0 %v721_v20 }
  0x75   :  { %660 = vmatprep.subr.bf16.mxu0 %v859_v0 }
  0x78   :  { %661 = vmatpush3.bf16.msra.mxu0 %v722_v21 }
  0x79   :  { %662 = vmatprep.subr.bf16.mxu0 %v859_v0 }
  0x7c   :  { %663 = vmatpush3.bf16.msra.mxu0 %v723_v22 }
  0x7d   :  { %664 = vmatprep.subr.bf16.mxu0 %v859_v0 }
  0x80   :  { %665 = vmatpush3.bf16.msra.mxu0 %v724_v23 }
  0x81   :  { %666 = vmatprep.subr.bf16.mxu0 %v859_v0 }
  0x84   :  { %667 = vmatpush3.bf16.msra.mxu0 %v725_v32 }
  0x85   :  { %668 = vmatprep.subr.bf16.mxu0 %v859_v0 }
  0x88   :  { %669 = vmatpush3.bf16.msra.mxu0 %v726_v33 }
 0x13e   :  { %v232_v25 = vpop.f32.mrb[0].mxu0 }
 0x13f   :  { %v233_v26 = vadd.f32 %v542_v24, %v232_v25  ;;  %v632_v27 = vpop.f32.mrb[1].mxu0 }
 0x140   :  { %v235_v28 = vpop.f32.mrb[2].mxu0 }
 0x141   :  { %v238_v29 = vmax.f32 %v233_v26, 0.0  ;;  %v633_v30 = vpop.f32.mrb[3].mxu0 }
 0x143   :  { %v239_v31 = vpack.c.bf16 %v238_v29, %v238_v29 }
 0x145   :  { %651 = vmatmul.mubr.bf16.vlgmr.msra.gmra.mrb[0].mxu1 %v239_v31 }
 0x146   :  { %690 = vmatprep.mubr.msk.bf16.mxu1 %vm860_vm0, %v859_v0  ;;  %675 = vmatpush3.bf16.msra.mxu1 %v727_v34 }
 0x147   :  { %676 = vmatprep.subr.bf16.mxu1 %v859_v0 }
 0x14a   :  { %677 = vmatpush3.bf16.msra.mxu1 %v728_v35 }
 0x14b   :  { %678 = vmatprep.subr.bf16.mxu1 %v859_v0 }
 0x14e   :  { %679 = vmatpush3.bf16.msra.mxu1 %v729_v36 }
 0x14f   :  { %680 = vmatprep.subr.bf16.mxu1 %v859_v0 }
 0x152   :  { %681 = vmatpush3.bf16.msra.mxu1 %v730_v37 }
 0x153   :  { %682 = vmatprep.subr.bf16.mxu1 %v859_v0 }
 0x156   :  { %683 = vmatpush3.bf16.msra.mxu1 %v731_v38 }
 0x157   :  { %684 = vmatprep.subr.bf16.mxu1 %v859_v0 }
 0x15a   :  { %685 = vmatpush3.bf16.msra.mxu1 %v732_v39 }
 0x15b   :  { %686 = vmatprep.subr.bf16.mxu1 %v859_v0 }
 0x15e   :  { %687 = vmatpush3.bf16.msra.mxu1 %v733_v48 }
 0x15f   :  { %688 = vmatprep.subr.bf16.mxu1 %v859_v0 }
 0x162   :  { %689 = vmatpush3.bf16.msra.mxu1 %v734_v49 }
 0x218   :  { %v327_v41 = vpop.f32.mrb[0].mxu1 }
 0x219   :  { %v328_v42 = vadd.f32 %v551_v40, %v327_v41  ;;  %v652_v43 = vpop.f32.mrb[1].mxu1 }
 0x21a   :  { %v330_v44 = vpop.f32.mrb[2].mxu1 }
 0x21b   :  { %v333_v45 = vmax.f32 %v328_v42, 0.0  ;;  %v653_v46 = vpop.f32.mrb[3].mxu1 }
 0x21d   :  { %v334_v47 = vpack.c.bf16 %v333_v45, %v333_v45 }
 0x21f   :  { %671 = vmatmul.mubr.bf16.vlgmr.msra.gmra.mrb[4].mxu0 %v334_v47 }
 0x2f2   :  { %v422_v51 = vpop.f32.mrb[4].mxu0 }
 0x2f3   :  { %v423_v52 = vadd.f32 %v560_v50, %v422_v51  ;;  %v672_v53 = vpop.f32.mrb[5].mxu0 }
 0x2f4   :  { %v425_v54 = vpop.f32.mrb[6].mxu0 }
 0x2f5   :  { %v428_v55 = vmax.f32 %v423_v52, 0.0  ;;  %v673_v56 = vpop.f32.mrb[7].mxu0 }
 0x2f7   :  { %v429_v57 = vpack.c.bf16 %v428_v55, %v428_v55 }
 0x2f9   :  { %691 = vmatmul.mubr.bf16.vlgmr.msra.gmra.mrb[4].mxu1 %v429_v57 }
 0x3cc   :  { %v517_v59 = vpop.f32.mrb[4].mxu1 }
 0x3cd   :  { %v518_v60 = vadd.f32 %v569_v58, %v517_v59  ;;  %v692_v61 = vpop.f32.mrb[5].mxu1 }
 0x3ce   :  { %v520_v62 = vpop.f32.mrb[6].mxu1 }
 0x3cf   :  { %v523_v63 = vmax.f32 %v518_v60, 0.0  ;;  %v693_v0 = vpop.f32.mrb[7].mxu1 }
 0x3d1   :  { %524 = vst [vmem:[#allocation10] sm:$0xff] %v523_v63 }
 0x3d2   :  { %834 = shalt.err (!%p831_p8)
}
 0x3d3   :  { %s835_s5 = scalar_lea.hbm %s1044_s6, 128 }
 0x3d4   :  { %p836_p9 = scmp.ne.s32.totalorder %s1044_s6, %s835_s5  ;;  %p839_p10 = scmp.lt.u32.totalorder %s835_s5, %s1044_s6 }
 0x3d6   :  { %p841_p11 = pnand %p839_p10, %p836_p9 }
 0x3d8   :  { %844 = shalt.err (!%p841_p11)
}
 0x3d9   :  { %534 = dma.vmem_to_hbm [thread:$0]  %s532_s29, 128, %s1044_s6, [#allocation4]  }
 0x3da   :  { %851 = dma.done.wait [#allocation4], 128  }
 0x3db   :  { %852 = vsyncadd [#allocation4], 4294967168 }
 0x3dc   :  { %538 = vsyncpa [#allocation3], 1 }
 0x3dd   :  { %539 = vsyncpa [#allocation6], 1 }
 0x3de   :  { %540 = vsyncpa [#allocation9], 1 }
 0x3df   :  { %541 = vsyncpa [#allocation4], 1 }

// kernel: _root_block_forward_impl.1
= control target key start
LH: loop header
LB: loop body
LE: loop exit
PB: predicated region body
PF: predicated region fallthrough
CT: control target
= control target key end

     0   :  { %11 = vsyncpa [#allocation3], 0  ;;  %s1038_s0 = inlined_call_operand.vmem [shape: bf16[8,128], index: 0, kind: input, shape index: {}]   ;;  %s1039_s1 = inlined_call_operand.hbm [shape: bf16[128,128], index: 1, kind: input, shape index: {}]   ;;  %s1040_s2 = inlined_call_operand.hbm [shape: bf16[128,128], index: 2, kind: input, shape index: {}]   ;;  %s1041_s3 = inlined_call_operand.hbm [shape: bf16[128,128], index: 3, kind: input, shape index: {}]   ;;  %s1042_s4 = inlined_call_operand.hbm [shape: bf16[128,128], index: 4, kind: input, shape index: {}]   ;;  %s1043_s5 = inlined_call_operand.vmem [shape: f32[8,128], index: 5, kind: input, shape index: {}]   ;;  %s1044_s6 = inlined_call_operand.hbm [shape: f32[8,128], index: 6, kind: output, shape index: {}]  }
   0x1   :  { %12 = vsyncpa [#allocation6], 0 }
   0x2   :  { %13 = vsyncpa [#allocation9], 0 }
   0x3   :  { %14 = vsyncpa [#allocation4], 0  ;;  %s853_s21 = smov [#allocation5]   ;;  %s854_s23 = smov [#allocation2]  }
   0x4   :  { %s34_s22 = sshll.u32 %s853_s21, 4  ;;  %s22_s24 = sshll.u32 %s854_s23, 4  ;;  %s35_s22 = int_to_ptr.vmem [resolvable:$true] %s34_s22  ;;  %s897_s24 = int_to_ptr.vmem [resolvable:$true] %s22_s24 }
   0x5   :  { %s735_s27 = scalar_lea.hbm %s1040_s2, 1024 }
   0x6   :  { %p736_p0 = scmp.ne.s32.totalorder %s1040_s2, %s735_s27  ;;  %p739_p1 = scmp.lt.u32.totalorder %s735_s27, %s1040_s2 }
   0x8   :  { %p741_p2 = pnand %p739_p1, %p736_p0 }
   0xa   :  { %744 = shalt.err (!%p741_p2)
}
   0xb   :  { %s745_s8 = scalar_lea.vmem %s35_s22, 1024  ;;  %p750_p4 = scmp.lt.s32.totalorder %s35_s22, %s35_s22 }
   0xc   :  { %p746_p3 = scmp.ne.s32.totalorder %s35_s22, %s745_s8  ;;  %p751_p5 = scmp.lt.s32.totalorder %s745_s8, %s745_s8 }
   0xe   :  { %p752_p6 = por %p751_p5, %p750_p4 }
  0x10   :  { %p753_p7 = pnand %p752_p6, %p746_p3 }
  0x12   :  { %756 = shalt.err (!%p753_p7)
}
  0x13   :  { %s855_s9 = smov 64   ;;  %s856_s10 = smov 4  }
  0x14   :  { %40 = dma.hbm_to_vmem [thread:$0]  %s1040_s2, 1024, %s35_s22, [#allocation6], %s855_s9, %s855_s9, %s856_s10  }
  0x15   :  { %s757_s15 = scalar_lea.hbm %s1039_s1, 1024 }
  0x16   :  { %p758_p8 = scmp.ne.s32.totalorder %s1039_s1, %s757_s15  ;;  %p761_p9 = scmp.lt.u32.totalorder %s757_s15, %s1039_s1 }
  0x18   :  { %p763_p10 = pnand %p761_p9, %p758_p8 }
  0x1a   :  { %766 = shalt.err (!%p763_p10)
}
  0x1b   :  { %s767_s20 = scalar_lea.vmem %s897_s24, 1024  ;;  %p772_p12 = scmp.lt.s32.totalorder %s897_s24, %s897_s24 }
  0x1c   :  { %p768_p11 = scmp.ne.s32.totalorder %s897_s24, %s767_s20  ;;  %p773_p13 = scmp.lt.s32.totalorder %s767_s20, %s767_s20 }
  0x1e   :  { %p774_p0 = por %p773_p13, %p772_p12 }
  0x20   :  { %p775_p1 = pnand %p774_p0, %p768_p11 }
  0x22   :  { %778 = shalt.err (!%p775_p1)
}
  0x23   :  { %28 = dma.hbm_to_vmem [thread:$0]  %s1039_s1, 1024, %s897_s24, [#allocation3], %s855_s9, %s855_s9, %s856_s10  }
  0x24   :  { %s857_s22 = smov [#allocation7]   ;;  %s858_s25 = smov [#allocation8]  }
  0x25   :  { %s46_s23 = sshll.u32 %s857_s22, 4  ;;  %s58_s26 = sshll.u32 %s858_s25, 4  ;;  %s47_s23 = int_to_ptr.vmem [resolvable:$true] %s46_s23  ;;  %s934_s26 = int_to_ptr.vmem [resolvable:$true] %s58_s26 }
  0x26   :  { %s779_s29 = scalar_lea.hbm %s1041_s3, 1024 }
  0x27   :  { %p780_p2 = scmp.ne.s32.totalorder %s1041_s3, %s779_s29  ;;  %p783_p3 = scmp.lt.u32.totalorder %s779_s29, %s1041_s3 }
  0x29   :  { %p785_p4 = pnand %p783_p3, %p780_p2 }
  0x2b   :  { %788 = shalt.err (!%p785_p4)
}
  0x2c   :  { %s789_s1 = scalar_lea.vmem %s47_s23, 1024  ;;  %p794_p6 = scmp.lt.s32.totalorder %s47_s23, %s47_s23 }
  0x2d   :  { %p790_p5 = scmp.ne.s32.totalorder %s47_s23, %s789_s1  ;;  %p795_p7 = scmp.lt.s32.totalorder %s789_s1, %s789_s1 }
  0x2f   :  { %p796_p8 = por %p795_p7, %p794_p6 }
  0x31   :  { %p797_p9 = pnand %p796_p8, %p790_p5 }
  0x33   :  { %800 = shalt.err (!%p797_p9)
}
  0x34   :  { %52 = dma.hbm_to_vmem [thread:$0]  %s1041_s3, 1024, %s47_s23, [#allocation6], %s855_s9, %s855_s9, %s856_s10  }
  0x35   :  { %s801_s15 = scalar_lea.hbm %s1042_s4, 1024 }
  0x36   :  { %p802_p10 = scmp.ne.s32.totalorder %s1042_s4, %s801_s15  ;;  %p805_p11 = scmp.lt.u32.totalorder %s801_s15, %s1042_s4 }
  0x38   :  { %p807_p12 = pnand %p805_p11, %p802_p10 }
  0x3a   :  { %810 = shalt.err (!%p807_p12)
}
  0x3b   :  { %s811_s20 = scalar_lea.vmem %s934_s26, 1024  ;;  %p816_p0 = scmp.lt.s32.totalorder %s934_s26, %s934_s26 }
  0x3c   :  { %p812_p13 = scmp.ne.s32.totalorder %s934_s26, %s811_s20  ;;  %p817_p1 = scmp.lt.s32.totalorder %s811_s20, %s811_s20 }
  0x3e   :  { %p818_p2 = por %p817_p1, %p816_p0 }
  0x40   :  { %p819_p3 = pnand %p818_p2, %p812_p13 }
  0x42   :  { %822 = shalt.err (!%p819_p3)
}
  0x43   :  { %64 = dma.hbm_to_vmem [thread:$0]  %s1042_s4, 1024, %s934_s26, [#allocation9], %s855_s9, %s855_s9, %s856_s10  }
  0x44   :  { %845 = dma.done.wait [#allocation3], 1024  }
  0x45   :  { %846 = vsyncadd [#allocation3], 4294966272 }
  0x46   :  { %847 = dma.done.wait [#allocation6], 2048  }
  0x47   :  { %848 = vsyncadd [#allocation6], 4294965248 }
  0x48   :  { %849 = dma.done.wait [#allocation9], 1024  }
  0x49   :  { %850 = vsyncadd [#allocation9], 4294966272  ;;  %v859_v0 = vmov 0.0   ;;  %vm860_vm0 = vmmov 0   ;;  %v703_v1 = vld [vmem:[#allocation2] sm:$0xff]   ;;  %v704_v2 = vld [vmem:[#allocation2 + $0x8] sm:$0xff]  }
  0x4a   :  { %614 = vmatprep.subr.bf16.mxu0 %v859_v0  ;;  %630 = vmatprep.mubr.msk.bf16.mxu0 %vm860_vm0, %v859_v0  ;;  %v705_v3 = vld [vmem:[#allocation2 + $0x10] sm:$0xff]   ;;  %v711_v4 = vld [vmem:[#allocation5] sm:$0xff]   ;;  %v706_v5 = vld [vmem:[#allocation2 + $0x18] sm:$0xff]   ;;  %s861_s28 = smov [#allocation10]  }
  0x4b   :  { %634 = vmatprep.subr.bf16.mxu1 %v859_v0  ;;  %650 = vmatprep.mubr.msk.bf16.mxu1 %vm860_vm0, %v859_v0  ;;  %v712_v6 = vld [vmem:[#allocation5 + $0x8] sm:$0xff]   ;;  %v707_v7 = vld [vmem:[#allocation2 + $0x20] sm:$0xff]   ;;  %v713_v8 = vld [vmem:[#allocation5 + $0x10] sm:$0xff]   ;;  %s531_s29 = sshll.u32 %s861_s28, 4  ;;  %s532_s29 = int_to_ptr.vmem [resolvable:$true] %s531_s29 }
  0x4c   :  { %615 = vmatpush3.bf16.msra.mxu0 %v703_v1  ;;  %635 = vmatpush3.bf16.msra.mxu1 %v711_v4  ;;  %v708_v9 = vld [vmem:[#allocation2 + $0x28] sm:$0xff]   ;;  %v714_v10 = vld [vmem:[#allocation5 + $0x18] sm:$0xff]   ;;  %v709_v11 = vld [vmem:[#allocation2 + $0x30] sm:$0xff]   ;;  %s823_s30 = scalar_lea.vmem %s532_s29, 128  ;;  %p828_p5 = scmp.lt.s32.totalorder %s532_s29, %s532_s29 }
  0x4d   :  { %616 = vmatprep.subr.bf16.mxu0 %v859_v0  ;;  %636 = vmatprep.subr.bf16.mxu1 %v859_v0  ;;  %v715_v12 = vld [vmem:[#allocation5 + $0x20] sm:$0xff]   ;;  %v710_v13 = vld [vmem:[#allocation2 + $0x38] sm:$0xff]   ;;  %v716_v14 = vld [vmem:[#allocation5 + $0x28] sm:$0xff]   ;;  %p824_p4 = scmp.ne.s32.totalorder %s532_s29, %s823_s30  ;;  %p829_p6 = scmp.lt.s32.totalorder %s823_s30, %s823_s30 }
  0x4e   :  { %v144_v15 = vld [vmem:[%s1038_s0] sm:$0xf]  ;;  %v717_v16 = vld [vmem:[#allocation5 + $0x30] sm:$0xff]   ;;  %v719_v18 = vld [vmem:[#allocation7] sm:$0xff]  }
  0x4f   :  { %v718_v17 = vld [vmem:[#allocation5 + $0x38] sm:$0xff]   ;;  %v720_v19 = vld [vmem:[#allocation7 + $0x8] sm:$0xff]   ;;  %v721_v20 = vld [vmem:[#allocation7 + $0x10] sm:$0xff]   ;;  %p830_p7 = por %p829_p6, %p828_p5 }
  0x50   :  { %617 = vmatpush3.bf16.msra.mxu0 %v704_v2  ;;  %637 = vmatpush3.bf16.msra.mxu1 %v712_v6  ;;  %v722_v21 = vld [vmem:[#allocation7 + $0x18] sm:$0xff]   ;;  %v723_v22 = vld [vmem:[#allocation7 + $0x20] sm:$0xff]   ;;  %v724_v23 = vld [vmem:[#allocation7 + $0x28] sm:$0xff]  }
  0x51   :  { %618 = vmatprep.subr.bf16.mxu0 %v859_v0  ;;  %638 = vmatprep.subr.bf16.mxu1 %v859_v0  ;;  %v542_v24 = vld [vmem:[%s1043_s5] ss:$0 sm:$0xff]  ;;  %v725_v32 = vld [vmem:[#allocation7 + $0x30] sm:$0xff]   ;;  %v727_v34 = vld [vmem:[#allocation8] sm:$0xff]   ;;  %p831_p8 = pnand %p830_p7, %p824_p4 }
  0x52   :  { %v726_v33 = vld [vmem:[#allocation7 + $0x38] sm:$0xff]   ;;  %v728_v35 = vld [vmem:[#allocation8 + $0x8] sm:$0xff]   ;;  %v729_v36 = vld [vmem:[#allocation8 + $0x10] sm:$0xff]  }
  0x53   :  { %v730_v37 = vld [vmem:[#allocation8 + $0x18] sm:$0xff]   ;;  %v731_v38 = vld [vmem:[#allocation8 + $0x20] sm:$0xff]   ;;  %v732_v39 = vld [vmem:[#allocation8 + $0x28] sm:$0xff]  }
  0x54   :  { %619 = vmatpush3.bf16.msra.mxu0 %v705_v3  ;;  %639 = vmatpush3.bf16.msra.mxu1 %v713_v8  ;;  %v551_v40 = vld [vmem:[%s1043_s5 + $0x1] ss:$0 sm:$0xff]  ;;  %v733_v48 = vld [vmem:[#allocation8 + $0x30] sm:$0xff]   ;;  %v560_v50 = vld [vmem:[%s1043_s5 + $0x2] ss:$0 sm:$0xff] }
  0x55   :  { %620 = vmatprep.subr.bf16.mxu0 %v859_v0  ;;  %640 = vmatprep.subr.bf16.mxu1 %v859_v0  ;;  %v734_v49 = vld [vmem:[#allocation8 + $0x38] sm:$0xff]  }
  0x56   :  { %v569_v58 = vld [vmem:[%s1043_s5 + $0x3] ss:$0 sm:$0xff] }
  0x58   :  { %621 = vmatpush3.bf16.msra.mxu0 %v706_v5  ;;  %641 = vmatpush3.bf16.msra.mxu1 %v714_v10 }
  0x59   :  { %622 = vmatprep.subr.bf16.mxu0 %v859_v0  ;;  %642 = vmatprep.subr.bf16.mxu1 %v859_v0 }
  0x5c   :  { %623 = vmatpush3.bf16.msra.mxu0 %v707_v7  ;;  %643 = vmatpush3.bf16.msra.mxu1 %v715_v12 }
  0x5d   :  { %624 = vmatprep.subr.bf16.mxu0 %v859_v0  ;;  %644 = vmatprep.subr.bf16.mxu1 %v859_v0 }
  0x60   :  { %625 = vmatpush3.bf16.msra.mxu0 %v708_v9  ;;  %645 = vmatpush3.bf16.msra.mxu1 %v716_v14 }
  0x61   :  { %626 = vmatprep.subr.bf16.mxu0 %v859_v0  ;;  %646 = vmatprep.subr.bf16.mxu1 %v859_v0 }
  0x64   :  { %627 = vmatpush3.bf16.msra.mxu0 %v709_v11  ;;  %647 = vmatpush3.bf16.msra.mxu1 %v717_v16 }
  0x65   :  { %628 = vmatprep.subr.bf16.mxu0 %v859_v0  ;;  %648 = vmatprep.subr.bf16.mxu1 %v859_v0 }
  0x68   :  { %629 = vmatpush3.bf16.msra.mxu0 %v710_v13  ;;  %649 = vmatpush3.bf16.msra.mxu1 %v718_v17 }
  0x69   :  { %654 = vmatprep.subr.bf16.mxu0 %v859_v0  ;;  %674 = vmatprep.subr.bf16.mxu1 %v859_v0 }
  0x6b   :  { %631 = vmatmul.mubr.bf16.vlgmr.msra.gmra.mrb[0].mxu0 %v144_v15 }
  0x6c   :  { %670 = vmatprep.mubr.msk.bf16.mxu0 %vm860_vm0, %v859_v0  ;;  %655 = vmatpush3.bf16.msra.mxu0 %v719_v18 }
  0x6d   :  { %656 = vmatprep.subr.bf16.mxu0 %v859_v0 }
  0x70   :  { %657 = vmatpush3.bf16.msra.mxu0 %v720_v19 }
  0x71   :  { %658 = vmatprep.subr.bf16.mxu0 %v859_v0 }
  0x74   :  { %659 = vmatpush3.bf16.msra.mxu0 %v721_v20 }
  0x75   :  { %660 = vmatprep.subr.bf16.mxu0 %v859_v0 }
  0x78   :  { %661 = vmatpush3.bf16.msra.mxu0 %v722_v21 }
  0x79   :  { %662 = vmatprep.subr.bf16.mxu0 %v859_v0 }
  0x7c   :  { %663 = vmatpush3.bf16.msra.mxu0 %v723_v22 }
  0x7d   :  { %664 = vmatprep.subr.bf16.mxu0 %v859_v0 }
  0x80   :  { %665 = vmatpush3.bf16.msra.mxu0 %v724_v23 }
  0x81   :  { %666 = vmatprep.subr.bf16.mxu0 %v859_v0 }
  0x84   :  { %667 = vmatpush3.bf16.msra.mxu0 %v725_v32 }
  0x85   :  { %668 = vmatprep.subr.bf16.mxu0 %v859_v0 }
  0x88   :  { %669 = vmatpush3.bf16.msra.mxu0 %v726_v33 }
 0x13e   :  { %v232_v25 = vpop.f32.mrb[0].mxu0 }
 0x13f   :  { %v233_v26 = vadd.f32 %v542_v24, %v232_v25  ;;  %v632_v27 = vpop.f32.mrb[1].mxu0 }
 0x140   :  { %v235_v28 = vpop.f32.mrb[2].mxu0 }
 0x141   :  { %v238_v29 = vmax.f32 %v233_v26, 0.0  ;;  %v633_v30 = vpop.f32.mrb[3].mxu0 }
 0x143   :  { %v239_v31 = vpack.c.bf16 %v238_v29, %v238_v29 }
 0x145   :  { %651 = vmatmul.mubr.bf16.vlgmr.msra.gmra.mrb[0].mxu1 %v239_v31 }
 0x146   :  { %690 = vmatprep.mubr.msk.bf16.mxu1 %vm860_vm0, %v859_v0  ;;  %675 = vmatpush3.bf16.msra.mxu1 %v727_v34 }
 0x147   :  { %676 = vmatprep.subr.bf16.mxu1 %v859_v0 }
 0x14a   :  { %677 = vmatpush3.bf16.msra.mxu1 %v728_v35 }
 0x14b   :  { %678 = vmatprep.subr.bf16.mxu1 %v859_v0 }
 0x14e   :  { %679 = vmatpush3.bf16.msra.mxu1 %v729_v36 }
 0x14f   :  { %680 = vmatprep.subr.bf16.mxu1 %v859_v0 }
 0x152   :  { %681 = vmatpush3.bf16.msra.mxu1 %v730_v37 }
 0x153   :  { %682 = vmatprep.subr.bf16.mxu1 %v859_v0 }
 0x156   :  { %683 = vmatpush3.bf16.msra.mxu1 %v731_v38 }
 0x157   :  { %684 = vmatprep.subr.bf16.mxu1 %v859_v0 }
 0x15a   :  { %685 = vmatpush3.bf16.msra.mxu1 %v732_v39 }
 0x15b   :  { %686 = vmatprep.subr.bf16.mxu1 %v859_v0 }
 0x15e   :  { %687 = vmatpush3.bf16.msra.mxu1 %v733_v48 }
 0x15f   :  { %688 = vmatprep.subr.bf16.mxu1 %v859_v0 }
 0x162   :  { %689 = vmatpush3.bf16.msra.mxu1 %v734_v49 }
 0x218   :  { %v327_v41 = vpop.f32.mrb[0].mxu1 }
 0x219   :  { %v328_v42 = vadd.f32 %v551_v40, %v327_v41  ;;  %v652_v43 = vpop.f32.mrb[1].mxu1 }
 0x21a   :  { %v330_v44 = vpop.f32.mrb[2].mxu1 }
 0x21b   :  { %v333_v45 = vmax.f32 %v328_v42, 0.0  ;;  %v653_v46 = vpop.f32.mrb[3].mxu1 }
 0x21d   :  { %v334_v47 = vpack.c.bf16 %v333_v45, %v333_v45 }
 0x21f   :  { %671 = vmatmul.mubr.bf16.vlgmr.msra.gmra.mrb[4].mxu0 %v334_v47 }
 0x2f2   :  { %v422_v51 = vpop.f32.mrb[4].mxu0 }
 0x2f3   :  { %v423_v52 = vadd.f32 %v560_v50, %v422_v51  ;;  %v672_v53 = vpop.f32.mrb[5].mxu0 }
 0x2f4   :  { %v425_v54 = vpop.f32.mrb[6].mxu0 }
 0x2f5   :  { %v428_v55 = vmax.f32 %v423_v52, 0.0  ;;  %v673_v56 = vpop.f32.mrb[7].mxu0 }
 0x2f7   :  { %v429_v57 = vpack.c.bf16 %v428_v55, %v428_v55 }
 0x2f9   :  { %691 = vmatmul.mubr.bf16.vlgmr.msra.gmra.mrb[4].mxu1 %v429_v57 }
 0x3cc   :  { %v517_v59 = vpop.f32.mrb[4].mxu1 }
 0x3cd   :  { %v518_v60 = vadd.f32 %v569_v58, %v517_v59  ;;  %v692_v61 = vpop.f32.mrb[5].mxu1 }
 0x3ce   :  { %v520_v62 = vpop.f32.mrb[6].mxu1 }
 0x3cf   :  { %v523_v63 = vmax.f32 %v518_v60, 0.0  ;;  %v693_v0 = vpop.f32.mrb[7].mxu1 }
 0x3d1   :  { %524 = vst [vmem:[#allocation10] sm:$0xff] %v523_v63 }
 0x3d2   :  { %834 = shalt.err (!%p831_p8)
}
 0x3d3   :  { %s835_s5 = scalar_lea.hbm %s1044_s6, 128 }
 0x3d4   :  { %p836_p9 = scmp.ne.s32.totalorder %s1044_s6, %s835_s5  ;;  %p839_p10 = scmp.lt.u32.totalorder %s835_s5, %s1044_s6 }
 0x3d6   :  { %p841_p11 = pnand %p839_p10, %p836_p9 }
 0x3d8   :  { %844 = shalt.err (!%p841_p11)
}
 0x3d9   :  { %534 = dma.vmem_to_hbm [thread:$0]  %s532_s29, 128, %s1044_s6, [#allocation4]  }
 0x3da   :  { %851 = dma.done.wait [#allocation4], 128  }
 0x3db   :  { %852 = vsyncadd [#allocation4], 4294967168 }
 0x3dc   :  { %538 = vsyncpa [#allocation3], 1 }
 0x3dd   :  { %539 = vsyncpa [#allocation6], 1 }
 0x3de   :  { %540 = vsyncpa [#allocation9], 1 }
 0x3df   :  { %541 = vsyncpa [#allocation4], 1 }

</bundles_post_ra>
